<compile_context>
chip_gen: v5e
topology: v5e:2x2
jax: 0.10.0
libtpu: 0.0.40
codegen_flags: <defaults>
</compile_context>

<pallas_src>
import functools
import math

import jax
import jax.numpy as jnp
from jax.experimental import pallas as pl
from jax.experimental.pallas import tpu as pltpu


# --------------------------------------------------------------------------
# Kernel
# --------------------------------------------------------------------------
def _fused_head_kernel(*refs, layers, head_dim, compute_dtype):
    """One (batch, head) grid step: all GCN sub-layers of this head plus its
    contribution to the final Linear, accumulated over the heads grid axis.

    refs (inputs, outputs, scratch):
      adj_ref   : (1, 1, N, N)      adjacency of this head/batch (compute_dtype)
      x_ref     : (1, N, D)         input node features (f32)
      wb_ref    : (1, D, D)         concat_l( W_l[:D, :] )           (compute_dtype)
      b2_ref    : (1, 1, D)         concat_l( 2*b_l )                (f32)
      wp_refs[l]: (1, head_dim, D)  piece-l weight rows, zero-padded on the left to
                                    full output width (compute_dtype), l < layers-1
      wproj_ref : (1, D, f_out)     this head's slice of the final Linear weight
      wres_ref  : (D, f_out)        sum_h Wproj_h (residual-path projection)
      blin_ref  : (1, f_out)        final Linear bias (f32)
      o_ref     : (1, N, f_out)     output block (f32), written at h == heads-1
      acc_ref   : (N, f_out) f32    VMEM accumulator over heads
    """
    hd = head_dim
    adj_ref, x_ref, wb_ref, b2_ref = refs[:4]
    wp_refs = refs[4:3 + layers]
    wproj_ref = refs[3 + layers]
    wres_ref = refs[4 + layers]
    blin_ref = refs[5 + layers]
    o_ref = refs[6 + layers]
    acc_ref = refs[7 + layers]

    h = pl.program_id(1)
    cd = compute_dtype

    adj = adj_ref[0, 0]                      # (N, N)  compute_dtype
    x = x_ref[0]                             # (N, D)  f32
    x_c = x.astype(cd)

    # 1/(row_sum + 1) from the resident adjacency tile.  Sum in f32 for exactness.
    denom = jnp.sum(adj.astype(jnp.float32), axis=-1, keepdims=True) + 1.0
    if jnp.dtype(cd) == jnp.dtype(jnp.float32):
        inv_d = 1.0 / denom
    else:
        inv_d = pl.reciprocal(denom, approx=True)

    # h == 0: seed the accumulator with the residual path:
    #   x @ (sum_h Wproj_h) == sum_h (x @ Wproj_h)  (the "+ gcn_inputs" of every head).
    @pl.when(h == 0)
    def _():
        acc_ref[...] = jnp.dot(x_c, wres_ref[...],
                               preferred_element_type=jnp.float32)

    # Wide base matmul: (adj@x + x) @ concat_l(W_l[:D,:]) computes the first-D-rows
    # contribution of ALL layers in one full-width (D x D) MXU pass.
    # (adj @ outputs + outputs) @ W + 2b == W(A·piece)+b + W(piece)+b summed over pieces.
    base = (jnp.dot(adj, x_c, preferred_element_type=jnp.float32) + x).astype(cd)
    pre = jnp.dot(base, wb_ref[0], preferred_element_type=jnp.float32) + b2_ref[0]

    # Incremental piece contributions (static unroll; `layers` is small).
    # Piece l = adj@g_l + g_l feeds only layers m > l; its weight is zero-padded on the
    # left so `pre += piece @ wp_l` touches exactly columns [(l+1)*hd, D).
    for l in range(layers - 1):
        g = jnp.maximum(pre[:, l * hd:(l + 1) * hd] * inv_d, 0.0)       # g_l (f32)
        piece = (jnp.dot(adj, g.astype(cd), preferred_element_type=jnp.float32)
                 + g).astype(cd)                                        # (N, hd)
        pre = pre + jnp.dot(piece, wp_refs[l][0],
                            preferred_element_type=jnp.float32)

    # concat_l(g_l) == relu(pre * inv_d) on the full (N, D) slab: no concatenation,
    # and the projection matmul runs at full MXU width in both dims.
    g_all = jnp.maximum(pre * inv_d, 0.0).astype(cd)
    acc_ref[...] += jnp.dot(g_all, wproj_ref[0],
                            preferred_element_type=jnp.float32)

    @pl.when(h == pl.num_programs(1) - 1)
    def _():
        o_ref[0] = (acc_ref[...] + blin_ref[...]).astype(o_ref.dtype)


# --------------------------------------------------------------------------
# pallas_call wrapper
# --------------------------------------------------------------------------
def fused_multi_head_gcn(adj, x, w_base, b2_full, w_piece, w_proj, w_res, b_lin, *,
                         heads, layers, head_dim, compute_dtype):
    """adj: (heads, B, N, N); x: (B, N, D); returns (B, N, f_out) f32."""
    B, N, D = x.shape
    f_out = w_proj.shape[-1]
    item = jnp.dtype(compute_dtype).itemsize

    kernel = functools.partial(_fused_head_kernel, layers=layers,
                               head_dim=head_dim, compute_dtype=compute_dtype)

    in_specs = [
        pl.BlockSpec((1, 1, N, N), lambda b, h: (h, b, 0, 0)),     # adjacency
        pl.BlockSpec((1, N, D), lambda b, h: (b, 0, 0)),           # x (resident per b)
        pl.BlockSpec((1, D, D), lambda b, h: (h, 0, 0)),           # W_base
        pl.BlockSpec((1, 1, D), lambda b, h: (h, 0, 0)),           # 2*bias
    ]
    for _ in range(layers - 1):
        in_specs.append(pl.BlockSpec((1, head_dim, D), lambda b, h: (h, 0, 0)))
    in_specs += [
        pl.BlockSpec((1, D, f_out), lambda b, h: (h, 0, 0)),       # W_proj head slice
        pl.BlockSpec((D, f_out), lambda b, h: (0, 0)),             # W_res (constant block)
        pl.BlockSpec((1, f_out), lambda b, h: (0, 0)),             # final bias (constant)
    ]

    # Advisory cost estimate.
    flops_step = (2 * N * N * D + 2 * N * N * head_dim * (layers - 1)   # adjacency matmuls
                  + 2 * N * D * D                                       # base @ W_base
                  + 2 * N * head_dim * D * (layers - 1)                 # piece contributions
                  + 2 * N * D * f_out)                                  # per-head projection
    flops = (flops_step * heads + 2 * N * D * f_out) * B                # + residual proj per batch
    bytes_accessed = (heads * B * N * N * item
                      + B * N * D * 4
                      + heads * (D * D + (layers - 1) * head_dim * D + D * f_out) * item
                      + D * f_out * item
                      + B * N * f_out * 4)

    # Explicit VMEM budget: double-buffered inputs/output + accumulator scratch.
    vmem_need = (2 * N * N * item
                 + 2 * N * D * 4
                 + 2 * (D * D + (layers - 1) * head_dim * D + 2 * D * f_out) * item
                 + 2 * (D + f_out) * 4
                 + 2 * N * f_out * 4
                 + N * f_out * 4)
    vmem_limit = int(min(max(int(vmem_need * 1.2) + (2 << 20), 32 << 20), 100 << 20))

    return pl.pallas_call(
        kernel,
        out_shape=jax.ShapeDtypeStruct((B, N, f_out), jnp.float32),
        grid=(B, heads),                       # heads innermost = reduction axis
        in_specs=in_specs,
        out_specs=pl.BlockSpec((1, N, f_out), lambda b, h: (b, 0, 0)),
        scratch_shapes=[pltpu.VMEM((N, f_out), jnp.float32)],
        compiler_params=pltpu.CompilerParams(
            dimension_semantics=("parallel", "arbitrary"),
            vmem_limit_bytes=vmem_limit),
        cost_estimate=pl.CostEstimate(flops=int(flops), transcendentals=0,
                                      bytes_accessed=int(bytes_accessed)),
    )(adj, x, w_base, b2_full, *w_piece, w_proj, w_res, b_lin)


# --------------------------------------------------------------------------
# Module-level wrapper (weight re-layout would normally be done once at init)
# --------------------------------------------------------------------------
def multi_graph_conv_layer(adj_list, gcn_inputs, params, *, heads, layers,
                           compute_dtype=jnp.bfloat16):
    """Forward pass equivalent to MultiGraphConvLayer.forward (eval mode)."""
    B, N, D = gcn_inputs.shape
    hd = D // layers
    assert hd * layers == D, "mem_dim must be divisible by layers"
    cd = compute_dtype

    # Single-pass adjacency prep: stack + cast (denominator is computed in-kernel).
    adj = jnp.stack(adj_list, axis=0).astype(cd)                  # (heads, B, N, N)

    # Per-head stacked layer weights.
    w_base_h, b2_h = [], []
    wp_h = [[] for _ in range(layers - 1)]
    for i in range(heads):
        wb_cols, b_cols = [], []
        for l in range(layers):
            wt, b = params["weight_list"][i * layers + l]         # (D + hd*l, hd), (1, hd)
            wb_cols.append(wt[:D, :])
            b_cols.append(2.0 * b)        # (Ax + x) @ W + 2b == W(Ax)+b + W(x)+b
        w_base_h.append(jnp.concatenate(wb_cols, axis=1))         # (D, D)
        b2_h.append(jnp.concatenate(b_cols, axis=1))              # (1, D)
        for l in range(layers - 1):
            # Piece l feeds layers m = l+1 .. layers-1; zero-pad columns [0, (l+1)*hd).
            cols = [jnp.zeros((hd, (l + 1) * hd), jnp.float32)]
            for m in range(l + 1, layers):
                wt_m = params["weight_list"][i * layers + m][0]
                cols.append(wt_m[D + l * hd: D + (l + 1) * hd, :])
            wp_h[l].append(jnp.concatenate(cols, axis=1))         # (hd, D)
    w_base = jnp.stack(w_base_h).astype(cd)                       # (heads, D, D)
    b2_full = jnp.stack(b2_h)                                     # (heads, 1, D) f32
    w_piece = [jnp.stack(wp_h[l]).astype(cd) for l in range(layers - 1)]

    wt_lin, b_lin = params["linear"]                              # (heads*D, f_out), (1, f_out)
    f_out = wt_lin.shape[-1]
    w_proj3 = wt_lin.reshape(heads, D, f_out)
    w_proj = w_proj3.astype(cd)                                   # per-head projection slices
    w_res = jnp.sum(w_proj3, axis=0).astype(cd)                   # x @ sum_h W_h == sum_h x @ W_h

    return fused_multi_head_gcn(adj, gcn_inputs, w_base, b2_full, w_piece,
                                w_proj, w_res, b_lin,
                                heads=heads, layers=layers, head_dim=hd,
                                compute_dtype=cd)


# --------------------------------------------------------------------------
# Deterministic parameter init (matches nn.Linear default U(-k, k), k=1/sqrt(fan_in))
# --------------------------------------------------------------------------
def init_params(key, mem_dim, layers, heads):
    head_dim = mem_dim // layers
    params = {"weight_list": []}
    for i in range(heads):
        for j in range(layers):
            f_in = mem_dim + head_dim * j
            k = 1.0 / math.sqrt(f_in)
            key, kw, kb = jax.random.split(key, 3)
            wt = jax.random.uniform(kw, (f_in, head_dim), jnp.float32, -k, k)
            b = jax.random.uniform(kb, (1, head_dim), jnp.float32, -k, k)
            params["weight_list"].append((wt, b))
    f_in = mem_dim * heads
    k = 1.0 / math.sqrt(f_in)
    key, kw, kb = jax.random.split(key, 3)
    params["linear"] = (
        jax.random.uniform(kw, (f_in, mem_dim), jnp.float32, -k, k),
        jax.random.uniform(kb, (1, mem_dim), jnp.float32, -k, k),
    )
    return params


# --------------------------------------------------------------------------
# Pure-JAX reference (mirrors the PyTorch forward exactly, eval mode, f32)
# --------------------------------------------------------------------------
def reference_forward(adj_list, gcn_inputs, params, *, heads, layers):
    multi_head = []
    for i in range(heads):
        adj = adj_list[i]
        denom = jnp.sum(adj, axis=2, keepdims=True) + 1.0
        outputs = gcn_inputs
        cache = [outputs]
        out_list = []
        for l in range(layers):
            idx = i * layers + l
            wt, b = params["weight_list"][idx]
            ax = jnp.einsum("bnm,bmd->bnd", adj, outputs)
            axw = (ax @ wt + b) + (outputs @ wt + b)
            g_axw = jax.nn.relu(axw / denom)
            cache.append(g_axw)
            outputs = jnp.concatenate(cache, axis=2)
            out_list.append(g_axw)
        multi_head.append(jnp.concatenate(out_list, axis=2) + gcn_inputs)
    final = jnp.concatenate(multi_head, axis=2)
    wt, b = params["linear"]
    return final @ wt + b


# --------------------------------------------------------------------------
if __name__ == "__main__":
    B, N = 2, 8
    mem_dim, layers, heads = 32, 2, 2

    key = jax.random.PRNGKey(0)
    key, k_x, k_a, k_p = jax.random.split(key, 4)

    gcn_inputs = jax.random.normal(k_x, (B, N, mem_dim), jnp.float32)
    adj_raw = jax.random.uniform(k_a, (heads, B, N, N), jnp.float32)
    adj_list = [(adj_raw[i] > 0.5).astype(jnp.float32) for i in range(heads)]

    params = init_params(k_p, mem_dim, layers, heads)
    ref = reference_forward(adj_list, gcn_inputs, params, heads=heads, layers=layers)

    # Exact path (f32 matmul operands): tight tolerance vs the f32 reference.
    out_f32 = multi_graph_conv_layer(adj_list, gcn_inputs, params,
                                     heads=heads, layers=layers,
                                     compute_dtype=jnp.float32)
    out_f32 = jax.block_until_ready(out_f32)
    assert out_f32.shape == (B, N, mem_dim)
    assert jnp.allclose(out_f32, ref, atol=2e-4, rtol=2e-4), "f32 path mismatch"

    # Fast path (bf16 matmul operands, f32 accumulation): looser tolerance.
    out_bf16 = multi_graph_conv_layer(adj_list, gcn_inputs, params,
                                      heads=heads, layers=layers,
                                      compute_dtype=jnp.bfloat16)
    out_bf16 = jax.block_until_ready(out_bf16)
    assert out_bf16.shape == (B, N, mem_dim)
    assert jnp.allclose(out_bf16, ref, atol=5e-2, rtol=5e-2), "bf16 path mismatch"

    print("KERNEL_OK")
</pallas_src>

<mosaic_0001>
module attributes {stable_mosaic.version = 11 : i64} {
  func.func @_fused_head_kernel(%arg0: i32, %arg1: i32, %arg2: memref<1x1x8x8xf32, #tpu.memory_space<vmem>>, %arg3: memref<1x8x32xf32, #tpu.memory_space<vmem>>, %arg4: memref<1x32x32xf32, #tpu.memory_space<vmem>>, %arg5: memref<1x1x32xf32, #tpu.memory_space<vmem>>, %arg6: memref<1x16x32xf32, #tpu.memory_space<vmem>>, %arg7: memref<1x32x32xf32, #tpu.memory_space<vmem>>, %arg8: memref<32x32xf32, #tpu.memory_space<vmem>>, %arg9: memref<1x32xf32, #tpu.memory_space<vmem>>, %arg10: memref<1x8x32xf32, #tpu.memory_space<vmem>>, %arg11: memref<8x32xf32, #tpu.memory_space<vmem>>) attributes {dimension_semantics = [#tpu.dimension_semantics<parallel>, #tpu.dimension_semantics<arbitrary>], iteration_bounds = array<i64: 2, 2>, scalar_prefetch = 0 : i64, scratch_operands = 1 : i64, tpu.core_type = #tpu.core_type<tc>, window_params = [{transform_indices = @transform_0, window_bounds = array<i64: 1, 1, 8, 8>}, {transform_indices = @transform_1, window_bounds = array<i64: 1, 8, 32>}, {transform_indices = @transform_2, window_bounds = array<i64: 1, 32, 32>}, {transform_indices = @transform_3, window_bounds = array<i64: 1, 1, 32>}, {transform_indices = @transform_4, window_bounds = array<i64: 1, 16, 32>}, {transform_indices = @transform_5, window_bounds = array<i64: 1, 32, 32>}, {pipeline_mode = #tpu.pipeline_mode<synchronous>, transform_indices = @transform_6, window_bounds = array<i64: 32, 32>}, {pipeline_mode = #tpu.pipeline_mode<synchronous>, transform_indices = @transform_7, window_bounds = array<i64: 1, 32>}, {transform_indices = @transform_8, window_bounds = array<i64: 1, 8, 32>}]} {
    %c0 = arith.constant 0 : index
    %c0_0 = arith.constant 0 : index
    %c0_1 = arith.constant 0 : index
    %c0_2 = arith.constant 0 : index
    %0 = vector.load %arg2[%c0, %c0_0, %c0_1, %c0_2] : memref<1x1x8x8xf32, #tpu.memory_space<vmem>>, vector<1x1x8x8xf32>
    %1 = vector.shape_cast %0 : vector<1x1x8x8xf32> to vector<8x8xf32>
    %c0_3 = arith.constant 0 : index
    %c0_4 = arith.constant 0 : index
    %c0_5 = arith.constant 0 : index
    %2 = vector.load %arg3[%c0_3, %c0_4, %c0_5] : memref<1x8x32xf32, #tpu.memory_space<vmem>>, vector<1x8x32xf32>
    %3 = vector.shape_cast %2 : vector<1x8x32xf32> to vector<8x32xf32>
    %cst = arith.constant dense<0.000000e+00> : vector<8xf32>
    %4 = vector.multi_reduction <add>, %1, %cst [1] : vector<8x8xf32> to vector<8xf32>
    %5 = vector.shape_cast %4 : vector<8xf32> to vector<8x1xf32>
    %cst_6 = arith.constant 1.000000e+00 : f32
    %6 = vector.broadcast %cst_6 : f32 to vector<8x1xf32>
    %7 = arith.addf %5, %6 : vector<8x1xf32>
    %cst_7 = arith.constant 1.000000e+00 : f32
    %8 = vector.broadcast %cst_7 : f32 to vector<8x1xf32>
    %9 = arith.divf %8, %7 : vector<8x1xf32>
    %c0_i32 = arith.constant 0 : i32
    %10 = arith.cmpi eq, %arg1, %c0_i32 : i32
    %11 = arith.extui %10 : i1 to i32
    %c0_i32_8 = arith.constant 0 : i32
    %12 = arith.cmpi ne, %11, %c0_i32_8 : i32
    scf.if %12 {
      %c0_33 = arith.constant 0 : index
      %c0_34 = arith.constant 0 : index
      %46 = vector.load %arg8[%c0_33, %c0_34] : memref<32x32xf32, #tpu.memory_space<vmem>>, vector<32x32xf32>
      %cst_35 = arith.constant dense<0.000000e+00> : vector<8x32xf32>
      %47 = tpu.matmul %3, %46, %cst_35 {dimension_numbers = #tpu.dot_dimension_numbers<[1], [0], [0], [1], [0, 0, 1, 1], [], []>} : vector<8x32xf32>, vector<32x32xf32>, vector<8x32xf32> -> vector<8x32xf32>
      %c0_36 = arith.constant 0 : index
      %c0_37 = arith.constant 0 : index
      %48 = vector.load %arg11[%c0_36, %c0_37] : memref<8x32xf32, #tpu.memory_space<vmem>>, vector<8x32xf32>
      tpu.vector_store %arg11[%c0_36, %c0_37], %47 {strides = array<i32>} : memref<8x32xf32, #tpu.memory_space<vmem>>, vector<8x32xf32>,
    } else {
    }
    %cst_9 = arith.constant dense<0.000000e+00> : vector<8x32xf32>
    %13 = tpu.matmul %1, %3, %cst_9 {dimension_numbers = #tpu.dot_dimension_numbers<[1], [0], [0], [1], [0, 0, 1, 1], [], []>} : vector<8x8xf32>, vector<8x32xf32>, vector<8x32xf32> -> vector<8x32xf32>
    %14 = arith.addf %13, %3 : vector<8x32xf32>
    %c0_10 = arith.constant 0 : index
    %c0_11 = arith.constant 0 : index
    %c0_12 = arith.constant 0 : index
    %15 = vector.load %arg4[%c0_10, %c0_11, %c0_12] : memref<1x32x32xf32, #tpu.memory_space<vmem>>, vector<1x32x32xf32>
    %16 = vector.shape_cast %15 : vector<1x32x32xf32> to vector<32x32xf32>
    %cst_13 = arith.constant dense<0.000000e+00> : vector<8x32xf32>
    %17 = tpu.matmul %14, %16, %cst_13 {dimension_numbers = #tpu.dot_dimension_numbers<[1], [0], [0], [1], [0, 0, 1, 1], [], []>} : vector<8x32xf32>, vector<32x32xf32>, vector<8x32xf32> -> vector<8x32xf32>
    %c0_14 = arith.constant 0 : index
    %c0_15 = arith.constant 0 : index
    %c0_16 = arith.constant 0 : index
    %18 = vector.load %arg5[%c0_14, %c0_15, %c0_16] : memref<1x1x32xf32, #tpu.memory_space<vmem>>, vector<1x1x32xf32>
    %19 = vector.shape_cast %18 : vector<1x1x32xf32> to vector<1x32xf32>
    %20 = vector.broadcast %19 : vector<1x32xf32> to vector<8x32xf32>
    %21 = arith.addf %17, %20 : vector<8x32xf32>
    %22 = vector.extract_strided_slice %21 {offsets = [0, 0], sizes = [8, 16], strides = [1, 1]} : vector<8x32xf32> to vector<8x16xf32>
    %23 = vector.broadcast %9 : vector<8x1xf32> to vector<8x16xf32>
    %24 = arith.mulf %22, %23 : vector<8x16xf32>
    %cst_17 = arith.constant 0.000000e+00 : f32
    %25 = vector.broadcast %cst_17 : f32 to vector<8x16xf32>
    %26 = arith.maximumf %24, %25 : vector<8x16xf32>
    %cst_18 = arith.constant dense<0.000000e+00> : vector<8x16xf32>
    %27 = tpu.matmul %1, %26, %cst_18 {dimension_numbers = #tpu.dot_dimension_numbers<[1], [0], [0], [1], [0, 0, 1, 1], [], []>} : vector<8x8xf32>, vector<8x16xf32>, vector<8x16xf32> -> vector<8x16xf32>
    %28 = arith.addf %27, %26 : vector<8x16xf32>
    %c0_19 = arith.constant 0 : index
    %c0_20 = arith.constant 0 : index
    %c0_21 = arith.constant 0 : index
    %29 = vector.load %arg6[%c0_19, %c0_20, %c0_21] : memref<1x16x32xf32, #tpu.memory_space<vmem>>, vector<1x16x32xf32>
    %30 = vector.shape_cast %29 : vector<1x16x32xf32> to vector<16x32xf32>
    %cst_22 = arith.constant dense<0.000000e+00> : vector<8x32xf32>
    %31 = tpu.matmul %28, %30, %cst_22 {dimension_numbers = #tpu.dot_dimension_numbers<[1], [0], [0], [1], [0, 0, 1, 1], [], []>} : vector<8x16xf32>, vector<16x32xf32>, vector<8x32xf32> -> vector<8x32xf32>
    %32 = arith.addf %21, %31 : vector<8x32xf32>
    %33 = vector.broadcast %9 : vector<8x1xf32> to vector<8x32xf32>
    %34 = arith.mulf %32, %33 : vector<8x32xf32>
    %cst_23 = arith.constant 0.000000e+00 : f32
    %35 = vector.broadcast %cst_23 : f32 to vector<8x32xf32>
    %36 = arith.maximumf %34, %35 : vector<8x32xf32>
    %c0_24 = arith.constant 0 : index
    %c0_25 = arith.constant 0 : index
    %37 = vector.load %arg11[%c0_24, %c0_25] : memref<8x32xf32, #tpu.memory_space<vmem>>, vector<8x32xf32>
    %c0_26 = arith.constant 0 : index
    %c0_27 = arith.constant 0 : index
    %c0_28 = arith.constant 0 : index
    %38 = vector.load %arg7[%c0_26, %c0_27, %c0_28] : memref<1x32x32xf32, #tpu.memory_space<vmem>>, vector<1x32x32xf32>
    %39 = vector.shape_cast %38 : vector<1x32x32xf32> to vector<32x32xf32>
    %cst_29 = arith.constant dense<0.000000e+00> : vector<8x32xf32>
    %40 = tpu.matmul %36, %39, %cst_29 {dimension_numbers = #tpu.dot_dimension_numbers<[1], [0], [0], [1], [0, 0, 1, 1], [], []>} : vector<8x32xf32>, vector<32x32xf32>, vector<8x32xf32> -> vector<8x32xf32>
    %41 = arith.addf %37, %40 : vector<8x32xf32>
    %c0_30 = arith.constant 0 : index
    %c0_31 = arith.constant 0 : index
    %42 = vector.load %arg11[%c0_30, %c0_31] : memref<8x32xf32, #tpu.memory_space<vmem>>, vector<8x32xf32>
    tpu.vector_store %arg11[%c0_30, %c0_31], %41 {strides = array<i32>} : memref<8x32xf32, #tpu.memory_space<vmem>>, vector<8x32xf32>,
    %c1_i32 = arith.constant 1 : i32
    %43 = arith.cmpi eq, %arg1, %c1_i32 : i32
    %44 = arith.extui %43 : i1 to i32
    %c0_i32_32 = arith.constant 0 : i32
    %45 = arith.cmpi ne, %44, %c0_i32_32 : i32
    scf.if %45 {
      %c0_33 = arith.constant 0 : index
      %c0_34 = arith.constant 0 : index
      %46 = vector.load %arg11[%c0_33, %c0_34] : memref<8x32xf32, #tpu.memory_space<vmem>>, vector<8x32xf32>
      %c0_35 = arith.constant 0 : index
      %c0_36 = arith.constant 0 : index
      %47 = vector.load %arg9[%c0_35, %c0_36] : memref<1x32xf32, #tpu.memory_space<vmem>>, vector<1x32xf32>
      %48 = vector.broadcast %47 : vector<1x32xf32> to vector<8x32xf32>
      %49 = arith.addf %46, %48 : vector<8x32xf32>
      %c0_37 = arith.constant 0 : index
      %c0_38 = arith.constant 0 : index
      %c0_39 = arith.constant 0 : index
      %50 = vector.load %arg10[%c0_37, %c0_38, %c0_39] : memref<1x8x32xf32, #tpu.memory_space<vmem>>, vector<1x8x32xf32>
      %51 = vector.shape_cast %50 : vector<1x8x32xf32> to vector<8x32xf32>
      %52 = vector.shape_cast %49 : vector<8x32xf32> to vector<1x8x32xf32>
      tpu.vector_store %arg10[%c0_37, %c0_38, %c0_39], %52 {strides = array<i32>} : memref<1x8x32xf32, #tpu.memory_space<vmem>>, vector<1x8x32xf32>,
    } else {
    }
    return
  }
  func.func @transform_0(%arg0: i32, %arg1: i32) -> (i32, i32, i32, i32) {
    %c0_i32 = arith.constant 0 : i32
    %c0_i32_0 = arith.constant 0 : i32
    %c0_i32_1 = arith.constant 0 : i32
    return %arg1, %arg0, %c0_i32, %c0_i32_0 : i32, i32, i32, i32
  }
  func.func @transform_1(%arg0: i32, %arg1: i32) -> (i32, i32, i32) {
    %c0_i32 = arith.constant 0 : i32
    %c0_i32_0 = arith.constant 0 : i32
    %c0_i32_1 = arith.constant 0 : i32
    return %arg0, %c0_i32, %c0_i32_0 : i32, i32, i32
  }
  func.func @transform_2(%arg0: i32, %arg1: i32) -> (i32, i32, i32) {
    %c0_i32 = arith.constant 0 : i32
    %c0_i32_0 = arith.constant 0 : i32
    %c0_i32_1 = arith.constant 0 : i32
    return %arg1, %c0_i32, %c0_i32_0 : i32, i32, i32
  }
  func.func @transform_3(%arg0: i32, %arg1: i32) -> (i32, i32, i32) {
    %c0_i32 = arith.constant 0 : i32
    %c0_i32_0 = arith.constant 0 : i32
    %c0_i32_1 = arith.constant 0 : i32
    return %arg1, %c0_i32, %c0_i32_0 : i32, i32, i32
  }
  func.func @transform_4(%arg0: i32, %arg1: i32) -> (i32, i32, i32) {
    %c0_i32 = arith.constant 0 : i32
    %c0_i32_0 = arith.constant 0 : i32
    %c0_i32_1 = arith.constant 0 : i32
    return %arg1, %c0_i32, %c0_i32_0 : i32, i32, i32
  }
  func.func @transform_5(%arg0: i32, %arg1: i32) -> (i32, i32, i32) {
    %c0_i32 = arith.constant 0 : i32
    %c0_i32_0 = arith.constant 0 : i32
    %c0_i32_1 = arith.constant 0 : i32
    return %arg1, %c0_i32, %c0_i32_0 : i32, i32, i32
  }
  func.func @transform_6(%arg0: i32, %arg1: i32) -> (i32, i32) {
    %c0_i32 = arith.constant 0 : i32
    %c0_i32_0 = arith.constant 0 : i32
    %c0_i32_1 = arith.constant 0 : i32
    return %c0_i32, %c0_i32_0 : i32, i32
  }
  func.func @transform_7(%arg0: i32, %arg1: i32) -> (i32, i32) {
    %c0_i32 = arith.constant 0 : i32
    %c0_i32_0 = arith.constant 0 : i32
    %c0_i32_1 = arith.constant 0 : i32
    return %c0_i32, %c0_i32_0 : i32, i32
  }
  func.func @transform_8(%arg0: i32, %arg1: i32) -> (i32, i32, i32) {
    %c0_i32 = arith.constant 0 : i32
    %c0_i32_0 = arith.constant 0 : i32
    %c0_i32_1 = arith.constant 0 : i32
    return %arg0, %c0_i32, %c0_i32_0 : i32, i32, i32
  }
}

</mosaic_0001>

<bundles_post_ra>
// kernel: tpu_custom_call.1
= control target key start
LH: loop header
LB: loop body
LE: loop exit
PB: predicated region body
PF: predicated region fallthrough
CT: control target
= control target key end

     0   :  { %s1941_s0 = inlined_call_operand.hbm [shape: f32[2,2,8,8], index: 0, kind: input, shape index: {}]   ;;  %s1942_s1 = inlined_call_operand.hbm [shape: f32[2,8,32], index: 1, kind: input, shape index: {}]   ;;  %s1943_s2 = inlined_call_operand.hbm [shape: f32[2,32,32], index: 2, kind: input, shape index: {}]   ;;  %s1944_s3 = inlined_call_operand.vmem [shape: f32[2,1,32], index: 3, kind: input, shape index: {}]   ;;  %s1945_s4 = inlined_call_operand.hbm [shape: f32[2,16,32], index: 4, kind: input, shape index: {}]   ;;  %s1946_s5 = inlined_call_operand.hbm [shape: f32[2,32,32], index: 5, kind: input, shape index: {}]   ;;  %s1947_s6 = inlined_call_operand.hbm [shape: f32[32,32], index: 6, kind: input, shape index: {}]   ;;  %s1948_s7 = inlined_call_operand.vmem [shape: f32[1,32], index: 7, kind: input, shape index: {}]   ;;  %s1949_s8 = inlined_call_operand.hbm [shape: f32[2,8,32], index: 8, kind: output, shape index: {}]  }
   0x1   :  { %1973 = sst [smem:[#allocation37_spill]] %s1941_s0 }
   0x2   :  { %1974 = sst [smem:[#allocation38_spill]] %s1942_s1 }
   0x3   :  { %1975 = sst [smem:[#allocation39_spill]] %s1944_s3 }
   0x4   :  { %1976 = sst [smem:[#allocation40_spill]] %s1945_s4 }
   0x5   :  { %1977 = sst [smem:[#allocation41_spill]] %s1947_s6 }
   0x6   :  { %1978 = sst [smem:[#allocation42_spill]] %s1948_s7 }
   0x7   :  { %1979 = sst [smem:[#allocation43_spill]] %s1949_s8 }
   0x8   :  { %13 = vsyncpa [#allocation4], 0 }
   0x9   :  { %15 = vsyncpa [#allocation4 + $0x1], 0 }
   0xa   :  { %16 = vsyncpa [#allocation7], 0 }
   0xb   :  { %18 = vsyncpa [#allocation7 + $0x1], 0 }
   0xc   :  { %19 = vsyncpa [#allocation10], 0 }
   0xd   :  { %21 = vsyncpa [#allocation10 + $0x1], 0 }
   0xe   :  { %22 = vsyncpa [#allocation13], 0 }
   0xf   :  { %23 = vsyncpa [#allocation5], 0 }
  0x10   :  { %25 = vsyncpa [#allocation5 + $0x1], 0  ;;  %s1532_s27 = smov 0   ;;  %s1534_s28 = smov 0  }
  0x11   :  { %s1536_s29 = smov 0   ;;  %s1538_s30 = smov 0  }
  0x12   :  { %s1540_s9 = smov 0   ;;  %s1542_s10 = smov 0  }
  0x13   :  { %s1544_s11 = smov 0   ;;  %s1546_s12 = smov 0  }
  0x14   :  { %s1548_s13 = smov 0   ;;  %s1550_s14 = smov 0  }
  0x15   :  { %s1552_s15 = smov 0   ;;  %s1554_s16 = smov 0  }
  0x16   :  { %s1556_s17 = smov 0   ;;  %s1558_s18 = smov 0  }
  0x17 LB: > { %1980 = sst [smem:[#allocation21_spill]] %s1438_s29  ;;  %s1603_s19 = sadd.s32 4294967295, %s1482_s18   ;;  %s1482_s18 = sphi %s1558_s18, %s31_s18   ;;  %s1478_s17 = sphi %s1556_s17, %s2045_s17   ;;  %s1474_s16 = sphi %s1554_s16, %s2044_s16   ;;  %s1470_s15 = sphi %s1552_s15, %s2036_s15   ;;  %s1466_s14 = sphi %s1550_s14, %s2043_s14   ;;  %s1462_s13 = sphi %s1548_s13, %s2035_s13   ;;  %s1458_s12 = sphi %s1546_s12, %s2042_s12   ;;  %s1454_s11 = sphi %s1544_s11, %s2041_s11   ;;  %s1450_s10 = sphi %s1542_s10, %s2033_s10   ;;  %s1446_s9 = sphi %s1540_s9, %s2032_s9   ;;  %s1442_s30 = sphi %s1538_s30, %s2031_s30   ;;  %s1438_s29 = sphi %s1536_s29, %s2030_s29   ;;  %s1434_s28 = sphi %s1534_s28, %s2040_s28   ;;  %s1430_s27 = sphi %s1532_s27, %s2039_s27  }
  0x18   : > { %1981 = sst [smem:[#allocation22_spill]] %s1442_s30  ;;  %s936_s20 = sadd.s32 4294967294, %s1482_s18  }
  0x19   : > { %1982 = sst [smem:[#allocation23_spill]] %s1446_s9  ;;  %s1950_s21 = sadd.s32 1, %s1474_s16 }
  0x1a   : > { %1983 = sst [smem:[#allocation24_spill]] %s1450_s10  ;;  %s43_s22 = sadd.s32 1, %s1478_s17 }
  0x1b   : > { %1984 = sst [smem:[#allocation25_spill]] %s1462_s13  ;;  %p1610_p0 = scmp.ge.s32.totalorder %s1950_s21, 2 }
  0x1c   : > { %1985 = sst [smem:[#allocation26_spill]] %s1466_s14  ;;  %p60_p1 = scmp.eq.s32.totalorder %s1482_s18, 0 }
  0x1d   : > { %1986 = sst [smem:[#allocation27_spill]] %s1470_s15  ;;  %p66_p2 = scmp.eq.s32.totalorder %s1603_s19, 0 }
  0x1e   : > { %1987 = sst [smem:[#allocation28_spill]] %s1478_s17  ;;  %s78_s24 = sadd.s32 1, %s1450_s10 }
  0x1f   : > { %s2047_s22 = smov (!%p1610_p0, %s43_s22), %s1478_s17  ;;  %p85_p3 = scmp.ne.s32.totalorder %s1450_s10, %s1446_s9 }
  0x20   : > { %p91_p4 = scmp.ne.s32.totalorder %s1446_s9, %s1442_s30  ;;  %p45_p5 = scmp.ge.s32.totalorder %s2047_s22, 2 }
  0x21   : > { %p261_p6 = scmp.eq.s32.totalorder %s1603_s19, 3  ;;  %p1627_p7 = por %p85_p3, %p60_p1 }
  0x22   : > { %p1633_p8 = por %p91_p4, %p66_p2  ;;  %s2049_s22 = smov (%p45_p5, %s2047_s22), 0 }
  0x23   : > { %1992 = sst [smem:[#allocation30_spill]] %s2049_s22  ;;  %p1639_p9 = por %p261_p6, %p85_p3 }
  0x24   : > { %s1990_s26 = scalar_select %p1633_p8, 1, 0 }
  0x25   : > { %s1993_s21 = scalar_select %p1639_p9, 1, 0 }
  0x26   : > { %1991 = sst [smem:[#allocation29_spill]] %s1990_s26  ;;  %p267_p10 = scmp.eq.s32.totalorder %s936_s20, 3 }
  0x27   : > { %1994 = sst [smem:[#allocation31_spill]] %s1993_s21  ;;  %s1645_s30 = ssub.s32 %s1478_s17, %s2049_s22 }
  0x28   : > { %p76_p11 = scmp.eq.s32.totalorder %s1645_s30, 0  ;;  %p1648_p12 = por %p267_p10, %p91_p4 }
  0x29   : > { %p1966_p13 = scmp.lt.s32.totalorder %s1482_s18, 4  ;;  %s1962_s20 = sand.u32 1, %s1482_s18  }
  0x2a   : > { %s1995_s8 = scalar_select %p1648_p12, 1, 0 }
  0x2b   : > { %s1654_s15 = scalar_select %p76_p11, %s1450_s10, %s78_s24  }
  0x2c   : > { %1996 = sst [smem:[#allocation32_spill]] %s1995_s8  ;;  %s327_s21 = sand.u32 1, %s1450_s10  }
  0x2d   : > { %1997 = sst [smem:[#allocation33_spill]] %s1654_s15  ;;  %s943_s22 = sshll.u32 %s327_s21, 3 }
  0x2e   : > { %s944_s7 = sshll.u32 %s1478_s17, 3  ;;  %s1998_s1 = sld [smem:[#allocation38_spill]] }
  0x2f   : > { %s329_s26 = scalar_lea.vmem [#allocation6], %s943_s22  ;;  %p1001_p3 = pnand %p1966_p13, %p1627_p7 }
  0x30   : > { %s337_s9 = sshll.u32 %s329_s26, 4  ;;  %s1668_s21 = scalar_lea.sflag [#allocation7], %s1962_s20  ;;  %s338_s9 = int_to_ptr.vmem [resolvable:$true] %s337_s9 }
  0x31   : > { %s1999_s3 = sadd.s32 1, %s1474_s16  ;;  %p111_p4 = scmp.ne.s32.totalorder %s1438_s29, %s1434_s28 }
  0x32   : > { %s2051_s3 = smov (%p1610_p0, %s1999_s3), 0  ;;  %p117_p5 = scmp.ne.s32.totalorder %s1434_s28, %s1430_s27 }
  0x33   : > { %2000 = sst [smem:[#allocation34_spill]] %s2051_s3  ;;  %p113_p7 = por %p111_p4, %p60_p1 }
  0x34   : > { %s333_s8 = scalar_lea.hbm %s1998_s1, %s944_s7  ;;  %s104_s7 = sadd.s32 1, %s1438_s29 }
  0x35   : > { %s335_s24 = sshll.u32 %s333_s8, 4  ;;  %s1682_s8 = ssub.s32 %s1474_s16, %s2051_s3  ;;  %s336_s24 = int_to_ptr.hbm [resolvable:$true] %s335_s24 }
  0x36   : > { %1003 = dma.hbm_to_vmem [thread:$0]  (!%p1001_p3), %s336_s24, 128, %s338_s9, %s1668_s21  }
  0x37   : > { %p102_p6 = scmp.eq.s32.totalorder %s1682_s8, 0  ;;  %p1691_p10 = por %p117_p5, %p66_p2 }
  0x38   : > { %s346_s22 = sand.u32 1, %s1438_s29   ;;  %p1703_p0 = pnand %p1966_p13, %p113_p7 }
  0x39   : > { %s1696_s9 = scalar_select %p102_p6, %s1438_s29, %s104_s7  }
  0x3a   : > { %s1699_s23 = sshll.u32 %s346_s22, 5  ;;  %s948_s27 = sshll.u32 %s346_s22, 4 }
  0x3b   : > { %2002 = sst [smem:[#allocation35_spill]] %s1696_s9  ;;  %s975_s26 = sshll.u32 %s1474_s16, 4 }
  0x3c   : > { %s2004_s4 = sld [smem:[#allocation40_spill]]  ;;  %s376_s3 = scalar_lea.vmem [#allocation9], %s948_s27 }
  0x3d   : > { %s384_s7 = sshll.u32 %s376_s3, 4  ;;  %s2005_s10 = sand.u32 1, %s1482_s18   ;;  %s385_s7 = int_to_ptr.vmem [resolvable:$true] %s384_s7 }
  0x3e   : > { %s1713_s9 = scalar_lea.sflag [#allocation10], %s2005_s10  ;;  %s1967_s29 = smov 128  }
  0x3f   : > { %s1969_s22 = smov 8   ;;  %p937_p11 = scmp.ge.s32.totalorder %s1482_s18, 1 }
  0x40   : > { %p274_p3 = scmp.lt.s32.totalorder %s1482_s18, 5  ;;  %s2006_s6 = sld [smem:[#allocation41_spill]] }
  0x41   : > { %s52_s24 = sadd.s32 1, %s1462_s13  ;;  %p65_p13 = scmp.ne.s32.totalorder %s1458_s12, %s1454_s11 }
  0x42   : > { %s381_s1 = scalar_lea.hbm %s2004_s4, %s975_s26  ;;  %p1726_p4 = pnand %p937_p11, %p274_p3 }
  0x43   : > { %s382_s15 = sshll.u32 %s381_s1, 4  ;;  %s49_s26 = sor.u32 %s1645_s30, %s1682_s8  ;;  %s383_s15 = int_to_ptr.hbm [resolvable:$true] %s382_s15 }
  0x44   : > { %1009 = dma.hbm_to_vmem [thread:$0]  (!%p1703_p0), %s383_s15, 256, %s385_s7, %s1713_s9, %s1967_s29, %s1967_s29, %s1969_s22  }
  0x45   : > { %s1486_s15 = smov [#allocation12]   ;;  %p993_p5 = pneg %p1726_p4 }
  0x46   : > { %s285_s10 = sshll.u32 %s2006_s6, 4  ;;  %s287_s27 = sshll.u32 %s1486_s15, 4  ;;  %s286_s10 = int_to_ptr.hbm [resolvable:$true] %s285_s10  ;;  %s288_s27 = int_to_ptr.vmem [resolvable:$true] %s287_s27 }
  0x47   : > { %p994_p6 = pnand %p993_p5, %p66_p2  ;;  %p50_p7 = scmp.eq.s32.totalorder %s49_s26, 0 }
  0x48   : > { %p59_p11 = scmp.ne.s32.totalorder %s1462_s13, %s1458_s12  ;;  %s304_s20 = sand.u32 1, %s1462_s13  }
  0x49   : > { %996 = dma.hbm_to_vmem [thread:$0]  (!%p994_p6), %s286_s10, 512, %s288_s27, [#allocation13], %s1967_s29, %s1967_s29, %s1969_s22  }
  0x4a   : > { %s1743_s7 = scalar_select %p50_p7, %s1462_s13, %s52_s24  }
  0x4b   : > { %p1747_p3 = por %p60_p1, %p59_p11  ;;  %s941_s30 = sshll.u32 %s1474_s16, 1 }
  0x4c   : > { %2008 = sst [smem:[#allocation36_spill]] %s1743_s7  ;;  %p1757_p5 = por %p66_p2, %p65_p13 }
  0x4d   : > { %s940_s10 = sshll.u32 %s304_s20, 3  ;;  %s312_s15 = sadd.s32 %s1478_s17, %s941_s30 }
  0x4e   : > { %s942_s27 = sshll.u32 %s312_s15, 3  ;;  %s2011_s0 = sld [smem:[#allocation37_spill]] }
  0x4f   : > { %s308_s22 = scalar_lea.vmem [#allocation3], %s940_s10  ;;  %p2012_p1 = scmp.lt.s32.totalorder %s1482_s18, 4 }
  0x50   : > { %s318_s4 = sshll.u32 %s308_s22, 4  ;;  %s974_s6 = sshll.u32 %s1474_s16, 5  ;;  %s319_s4 = int_to_ptr.vmem [resolvable:$true] %s318_s4 }
  0x51   : > { %p998_p13 = pnand %p2012_p1, %p1747_p3  ;;  %s353_s30 = scalar_lea.hbm %s1943_s2, %s974_s6 }
  0x52   : > { %s305_s15 = scalar_lea.sflag [#allocation4], %s304_s20  ;;  %s348_s26 = scalar_lea.vmem [#allocation8], %s1699_s23 }
  0x53   : > { %s356_s10 = sshll.u32 %s348_s26, 4  ;;  %s2014_s22 = smov 128   ;;  %s357_s10 = int_to_ptr.vmem [resolvable:$true] %s356_s10 }
  0x54   : > { %s314_s29 = scalar_lea.hbm %s2011_s0, %s942_s27  ;;  %s354_s27 = sshll.u32 %s353_s30, 4  ;;  %s355_s27 = int_to_ptr.hbm [resolvable:$true] %s354_s27 }
  0x55   : > { %s316_s11 = sshll.u32 %s314_s29, 4  ;;  %s2013_s29 = smov 8   ;;  %s317_s11 = int_to_ptr.hbm [resolvable:$true] %s316_s11 }
  0x56   : > { %1000 = dma.hbm_to_vmem [thread:$0]  (!%p998_p13), %s317_s11, 128, %s319_s4, %s305_s15  }
  0x57   : > { %1006 = dma.hbm_to_vmem [thread:$0]  (!%p1703_p0), %s355_s27, 512, %s357_s10, %s1668_s21, %s2014_s22, %s2014_s22, %s2013_s29  }
  0x58   : > { %s403_s0 = scalar_lea.hbm %s1946_s5, %s974_s6  ;;  %s398_s7 = scalar_lea.vmem [#allocation11], %s1699_s23 }
  0x59   : > { %s404_s13 = sshll.u32 %s403_s0, 4  ;;  %s406_s17 = sshll.u32 %s398_s7, 4  ;;  %s405_s13 = int_to_ptr.hbm [resolvable:$true] %s404_s13  ;;  %s407_s17 = int_to_ptr.vmem [resolvable:$true] %s406_s17 }
  0x5a   : > { %1012 = dma.hbm_to_vmem [thread:$0]  (!%p1703_p0), %s405_s13, 512, %s407_s17, %s1713_s9, %s2014_s22, %s2014_s22, %s2013_s29  }
  0x5b   : > { %418 = sbr.rel (%p1726_p4) target bundleno = 1082 (0x43a), region = 52  ;;  %s420_s4 = sand.u32 (!%p1726_p4), 1, %s1458_s12  }
  0x5c   : > { %s1793_s21 = sshll.u32 (!%p1726_p4), %s420_s4, 3  ;;  %s421_s6 = scalar_lea.sflag (!%p1726_p4), [#allocation4], %s420_s4 }
  0x5d   : > { %s424_s0 = scalar_lea.vmem (!%p1726_p4), [#allocation3], %s1793_s21 }
  0x60   : > { %1405 = dma.done.wait (%p1757_p5), %s421_s6, 128  }
  0x61   : > { %1407 = vsyncadd (%p1757_p5), %s421_s6, 4294967168  ;;  %s2015_s23 = sld [smem:[#allocation23_spill]]  ;;  %s430_s9 = sand.u32 1, %s1603_s19  }
  0x62   : > { %s431_s20 = scalar_lea.sflag [#allocation7], %s430_s9 }
  0x67   : > { %s432_s25 = sand.u32 1, %s2015_s23  }
  0x68   : > { %s1804_s3 = sshll.u32 %s432_s25, 3 }
  0x69   : > { %s434_s11 = scalar_lea.vmem [#allocation6], %s1804_s3 }
  0x6a   : > { %1409 = dma.done.wait (%p1633_p8), %s431_s20, 128  }
  0x6b   : > { %1411 = vsyncadd (%p1633_p8), %s431_s20, 4294967168  ;;  %s442_s8 = sand.u32 1, %s1434_s28  }
  0x6c   : > { %s957_s30 = sshll.u32 %s442_s8, 5 }
  0x6d   : > { %s1812_s15 = scalar_lea.vmem [#allocation8], %s957_s30 }
  0x6e   : > { %1413 = dma.done.wait (%p1691_p10), %s431_s20, 512  }
  0x6f   : > { %1415 = vsyncadd (%p1691_p10), %s431_s20, 4294966784  ;;  %s1818_s27 = sshll.u32 %s442_s8, 4  ;;  %s451_s26 = scalar_lea.sflag [#allocation10], %s430_s9 }
  0x70   : > { %s454_s10 = scalar_lea.vmem [#allocation9], %s1818_s27 }
  0x71   : > { %1417 = dma.done.wait (%p1691_p10), %s451_s26, 768  }
  0x72   : > { %1419 = vsyncadd (%p1691_p10), %s451_s26, 4294966528  ;;  %s1825_s29 = scalar_lea.vmem [#allocation11], %s957_s30 }
  0x73   : > { %1421 = dma.done.wait (%p66_p2), [#allocation13], 512  }
  0x74   : > { %1423 = vsyncadd (%p66_p2), [#allocation13], 4294966784  ;;  %s2017_s22 = sld [smem:[#allocation26_spill]]  ;;  %vm531_vm0 = vcmask 64512   ;;  %v530_v0 = vld [vmem:[%s434_s11] sm:$0xff]  ;;  %v529_v1 = vld [vmem:[%s424_s0] sm:$0xff] }
  0x75   : > { %s2018_s7 = sld [smem:[#allocation39_spill]]  ;;  %v532_v2 = vsel %vm531_vm0, %v529_v1, 0.0  ;;  %s525_s19 = scalar_lea.vmem [#allocation14], %s1804_s3 }
  0x76   : > { %533 = vadd.xlane.f32.xlu0 %v532_v2 }
  0x7a   : > { %p526_p8 = scmp.lt.s32.totalorder %s2017_s22, 1  ;;  %p962_p2 = scmp.ne.s32.totalorder %s2017_s22, 0 }
  0x7c   : > { %s1833_s1 = scalar_select %p526_p8, %s2017_s22, 1 }
  0x7e   : > { %s528_s4 = scalar_lea.vmem %s2018_s7, %s1833_s1 }
  0xe9   : > { %v534_v3 = vpop.xlane.xlu0 %533 }
  0xea   : > { %v535_v4 = vadd.f32 1.0, %v534_v3 }
  0xec   : > { %1136 = vrcp.f32 %v535_v4  ;;  %v547_v8 = vand.u32 2147483648, %v535_v4  ;;  %v545_v10 = vand.u32 2147483647, %v535_v4  ;;  %vm541_vm2 = vweird.f32 %v535_v4 }
  0xee   : > { %v548_v12 = vor.u32 1.1754944e-38, %v547_v8  ;;  %vm546_vm4 = vcmp.eq.f32.partialorder %v545_v10, 8.507059e+37 }
  0xf2   : > { %v1137_v5 = vpop.eup %1136 }
  0xf3   : > { %v537_v6 = vmul.f32 %v1137_v5, %v535_v4  ;;  %vm542_vm1 = vweird.f32 %v1137_v5 }
  0xf4   : > { %vm543_vm3 = vmor %vm541_vm2, %vm542_vm1 }
  0xf5   : > { %v538_v7 = vsub.f32 1.0, %v537_v6 }
  0xf7   : > { %v539_v9 = vmul.f32 %v1137_v5, %v538_v7 }
  0xf8   : > { %554 = sbr.rel (%p962_p2) target bundleno = 388 (0x184), region = 80 }
  0xf9   : > { %v540_v11 = vadd.f32 %v1137_v5, %v539_v9 }
  0xfb   : > { %v544_v13 = vsel %vm543_vm3, %v1137_v5, %v540_v11 }
  0xfc   : > { %v549_v14 = vsel %vm546_vm4, %v548_v12, %v544_v13 }
  0xfd   : > { %v558_v15 = vld [vmem:[#allocation12 + $0x18] sm:$0xff]  ;;  %v557_v16 = vld [vmem:[#allocation12 + $0x10] sm:$0xff]  ;;  %v556_v17 = vld [vmem:[#allocation12 + $0x8] sm:$0xff]  ;;  %vm559_vm5 = vcmask 261120  }
  0xfe   : > { %575 = vmatpush.msra.mxu0 %v558_v15  ;;  %v555_v18 = vld [vmem:[#allocation12] sm:$0xff] }
 0x100   : > { %576 = vmatpush.msra.mxu0 %v557_v16 }
 0x102   : > { %577 = vmatpush.msra.mxu0 %v556_v17 }
 0x104   : > { %578 = vmatpush.msra.mxu0 %v555_v18 }
 0x105   : > { %963 = vmatmul.msk.f32.vlgmr.msra.gmra.mxu0 %vm559_vm5, %v530_v0 }
 0x182   : > { %v580_v19 = vpop.f32.mrf.mxu0 }
 0x183   : > { %583 = vst.msk [vmem:[#allocation2] sm:$0xff] %vm559_vm5, %v580_v19 }
 0x184 PF: > { %602 = vmatpush.msra.mxu0 %v530_v0  ;;  %v610_v20 = vld [vmem:[%s1812_s15 + $0x18] sm:$0xff]  ;;  %v609_v21 = vld [vmem:[%s1812_s15 + $0x10] sm:$0xff]  ;;  %v608_v22 = vld [vmem:[%s1812_s15 + $0x8] sm:$0xff]  ;;  %vm615_vm6 = vcmask 261120   ;;  %vm663_vm7 = vcmask 130048   ;;  %s2020_s0 = sld [smem:[#allocation26_spill]] }
 0x185   : > { %964 = vmatmul.msk.f32.vlgmr.msra.gmra.mxu0 %vm531_vm0, %v529_v1  ;;  %631 = vmatpush.msra.mxu1 %v610_v20  ;;  %v607_v23 = vld [vmem:[%s1812_s15] sm:$0xff]  ;;  %v1138_v26 = vld [vmem:[%s528_s4] ss:$0 sm:$0xff]  ;;  %v693_v36 = vld [vmem:[%s1825_s29 + $0x10] sm:$0xff] }
 0x186   : > { %v662_v31 = vld [vmem:[%s454_s10 + $0x8] sm:$0xff]  ;;  %v661_v32 = vld [vmem:[%s454_s10] sm:$0xff] }
 0x187   : > { %632 = vmatpush.msra.mxu1 %v609_v21  ;;  %681 = vmatpush.msra.mxu3 %v662_v31  ;;  %v694_v33 = vld [vmem:[%s1825_s29 + $0x18] sm:$0xff]  ;;  %v692_v37 = vld [vmem:[%s1825_s29 + $0x8] sm:$0xff]  ;;  %v691_v38 = vld [vmem:[%s1825_s29] sm:$0xff] }
 0x188   : > { %710 = vmatpush.msrb.mxu0 %v694_v33 }
 0x189   : > { %633 = vmatpush.msra.mxu1 %v608_v22  ;;  %682 = vmatpush.msra.mxu3 %v661_v32 }
 0x18a   : > { %711 = vmatpush.msrb.mxu0 %v693_v36  ;;  %v690_v43 = vld [vmem:[#allocation2] sm:$0xff]  ;;  %p969_p10 = scmp.ne.s32.totalorder %s2020_s0, 1 }
 0x18b   : > { %634 = vmatpush.msra.mxu1 %v607_v23  ;;  %s2021_s9 = sld [smem:[#allocation42_spill]] (!%p969_p10) }
 0x18c   : > { %712 = vmatpush.msrb.mxu0 %v692_v37 }
 0x18e   : > { %713 = vmatpush.msrb.mxu0 %v691_v38 }
 0x202   : > { %v604_v24 = vpop.f32.mrf.mxu0 }
 0x203   : > { %v605_v25 = vadd.f32 %v604_v24, %v530_v0 }
 0x205   : > { %965 = vmatmul.msk.f32.vlgmr.msra.gmra.mxu1 %vm615_vm6, %v605_v25 }
 0x282   : > { %v636_v27 = vpop.f32.mrf.mxu1 }
 0x283   : > { %v637_v28 = vadd.f32 %v1138_v26, %v636_v27 }
 0x285   : > { %v639_v29 = vmul.f32 %v637_v28, %v549_v14 }
 0x287   : > { %v640_v30 = vmax.f32 %v639_v29, 0.0 }
 0x289   : > { %656 = vmatpush.msra.mxu2 %v640_v30 }
 0x28a   : > { %966 = vmatmul.msk.f32.vlgmr.msra.gmra.mxu2 %vm531_vm0, %v529_v1 }
 0x30d   : > { %v658_v34 = vpop.f32.mrf.mxu2 }
 0x30e   : > { %v659_v35 = vadd.f32 %v658_v34, %v640_v30 }
 0x310   : > { %967 = vmatmul.msk.f32.vlgmr.msra.gmra.mxu3 %vm663_vm7, %v659_v35 }
 0x393   : > { %v684_v39 = vpop.f32.mrf.mxu3 }
 0x394   : > { %v687_v40 = vadd.f32 %v684_v39, %v637_v28 }
 0x396   : > { %v688_v41 = vmul.f32 %v687_v40, %v549_v14 }
 0x398   : > { %v689_v42 = vmax.f32 %v688_v41, 0.0 }
 0x39a   : > { %968 = vmatmul.msk.f32.vlgmr.msrb.gmra.mxu0 %vm615_vm6, %v689_v42 }
 0x416   : > { %723 = sbr.rel (%p969_p10) target bundleno = 1061 (0x425), region = 84 }
 0x417   : > { %v715_v44 = vpop.f32.mrf.mxu0 }
 0x418   : > { %v718_v45 = vadd.f32 %v715_v44, %v690_v43 }
 0x41a   : > { %719 = vst.msk [vmem:[#allocation2] sm:$0xff] %vm615_vm6, %v718_v45 }
 0x41b   : > { %v1139_v47 = vld [vmem:[%s2021_s9] ss:$0 sm:$0xff] }
 0x421   : > { %v724_v46 = vld [vmem:[#allocation2] sm:$0xff] }
 0x422   : > { %v729_v48 = vadd.f32 %v1139_v47, %v724_v46 }
 0x424   : > { %730 = vst.msk [vmem:[%s525_s19] sm:$0xff] %vm615_vm6, %v729_v48 }
 0x425 PF: > { %s2022_s20 = sld [smem:[#allocation27_spill]]  ;;  %s744_s29 = sshll.u32 %s525_s19, 4  ;;  %s745_s29 = int_to_ptr.vmem [resolvable:$true] %s744_s29 }
 0x426   : > { %s2025_s26 = sld [smem:[#allocation43_spill]]  ;;  %s732_s1 = scalar_lea.sflag [#allocation5], %s432_s25 }
 0x42b   : > { %s971_s30 = sshll.u32 %s2022_s20, 3 }
 0x42c   : > { %s742_s10 = scalar_lea.hbm %s2025_s26, %s971_s30  ;;  %s1340_s14 = scalar_lea.hbm %s2025_s26, 16 }
 0x42d   : > { %s746_s22 = sshll.u32 %s742_s10, 4  ;;  %s747_s22 = int_to_ptr.hbm [resolvable:$true] %s746_s22 }
 0x42e   : > { %s1334_s24 = sshra.s32 %s747_s22, 4  ;;  %s1335_s24 = int_to_ptr.hbm [resolvable:$true] %s1334_s24 }
 0x42f   : > { %s1336_s13 = scalar_lea.hbm %s1335_s24, 8  ;;  %p1341_p7 = scmp.lt.s32.totalorder %s1335_s24, %s2025_s26 }
 0x430   : > { %p1337_p0 = scmp.ne.s32.totalorder %s1335_s24, %s1336_s13  ;;  %p1342_p11 = scmp.lt.s32.totalorder %s1340_s14, %s1336_s13 }
 0x432   : > { %p1338_p4 = pnand %p1337_p0, %p1639_p9  ;;  %p1343_p3 = por %p1342_p11, %p1341_p7 }
 0x434   : > { %p1339_p6 = pneg %p1338_p4 }
 0x436   : > { %p1344_p5 = pnand %p1343_p3, %p1339_p6 }
 0x438   : > { %1347 = shalt.err (!%p1344_p5)
}
 0x439   : > { %991 = dma.vmem_to_hbm [thread:$0]  (%p1639_p9), %s745_s29, 128, %s747_s22, %s732_s1  }
 0x43a PF: > { %s2026_s25 = sld [smem:[#allocation22_spill]]  ;;  %p1020_p1 = scmp.ge.s32.totalorder %s1482_s18, 2 }
 0x43c   : > { %p1014_p13 = pnand %p1020_p1, %p1648_p12 }
 0x43e   : > { %p1015_p8 = pneg %p1014_p13 }
 0x440   : > { %s758_s19 = sand.u32 1, %s2026_s25  }
 0x441   : > { %s759_s0 = scalar_lea.sflag [#allocation5], %s758_s19 }
 0x442   : > { %1425 = dma.done.wait (%p1015_p8), %s759_s0, 128  }
 0x443   : > { %1427 = vsyncadd (%p1015_p8), %s759_s0, 4294967168  ;;  %s31_s18 = sadd.s32 1, %s1482_s18   ;;  %s2029_s17 = sld [smem:[#allocation21_spill]] }
 0x444   : > { %p1894_p2 = scmp.ge.s32.totalorder %s31_s18, 6   ;;  %s2030_s29 = sld [smem:[#allocation35_spill]] }
 0x445   : > { %s2031_s30 = sld [smem:[#allocation23_spill]]  ;;  %s2039_s27 = smov %s1434_s28 }
 0x446   : > { %s2032_s9 = sld [smem:[#allocation24_spill]]  ;;  %s2041_s11 = smov %s1458_s12 }
 0x447   : > { %s2033_s10 = sld [smem:[#allocation33_spill]]  ;;  %s2043_s14 = smov %s1474_s16 }
 0x448   : > { %s2034_s20 = sld [smem:[#allocation25_spill]] }
 0x449   : > { %s2035_s13 = sld [smem:[#allocation36_spill]]  ;;  %s2040_s28 = smov %s2029_s17 }
 0x44a   : > { %s2036_s15 = sld [smem:[#allocation28_spill]] }
 0x44b   : > { %s2037_s8 = sld [smem:[#allocation34_spill]] }
 0x44c   : > { %s2038_s22 = sld [smem:[#allocation30_spill]] }
 0x44e   : > { %s2042_s12 = smov %s2034_s20  ;;  %30 = sbr.rel (!%p1894_p2) target bundleno = 23 (0x17), region = 160 }
 0x451   : > { %s2044_s16 = smov %s2037_s8 }
 0x452   : > { %s2045_s17 = smov %s2038_s22 }
 0x453   :  { %765 = vsyncpa [#allocation4], 1 }
 0x454   :  { %767 = vsyncpa [#allocation4 + $0x1], 1 }
 0x455   :  { %768 = vsyncpa [#allocation7], 1 }
 0x456   :  { %770 = vsyncpa [#allocation7 + $0x1], 1 }
 0x457   :  { %771 = vsyncpa [#allocation10], 1 }
 0x458   :  { %773 = vsyncpa [#allocation10 + $0x1], 1 }
 0x459   :  { %774 = vsyncpa [#allocation13], 1 }
 0x45a   :  { %775 = vsyncpa [#allocation5], 1 }
 0x45b   :  { %777 = vsyncpa [#allocation5 + $0x1], 1 }

</bundles_post_ra>
